<compile_context>
chip_gen: v5e
topology: v5e:2x2
jax: 0.10.0
libtpu: 0.0.40
codegen_flags: <defaults>
</compile_context>

<pallas_src>
import math

import jax
import jax.numpy as jnp
from jax import lax
from jax.experimental import pallas as pl
from jax.experimental.pallas import tpu as pltpu


# ----------------------------------------------------------------------------
# Kernel factory
# ----------------------------------------------------------------------------
def _make_sdpa_kernel(*, b_blk, scale, has_prev, attn_mask_mode, has_kpm,
                      with_attn, with_scores):
    """Build a kernel that processes `b_blk` batch elements (all heads) per step.

    attn_mask_mode: None | "add" (float additive mask) | "fill" (bool masked_fill).
    """

    def kernel(*refs):
        it = iter(refs)
        q_ref = next(it)                                   # [b, H, Lq, dk]
        kt_ref = next(it)                                  # [b, H, Ls, dk]
        v_ref = next(it)                                   # [b, H, Ls, dv]
        prev_ref = next(it) if has_prev else None          # [b, H, Lq, Ls]
        am_ref = next(it) if attn_mask_mode else None      # [Lq, Ls] f32
        kpm_ref = next(it) if has_kpm else None            # [b, 1, Ls] f32 {0,1}
        out_ref = next(it)                                 # [b, H, Lq, dv]
        attn_ref = next(it) if with_attn else None         # [b, H, Lq, Ls]
        scores_ref = next(it) if with_scores else None     # [b, H, Lq, Ls]

        # Hoisted once per grid step (shared across the whole batch block).
        am_add = am_fill = None
        if attn_mask_mode == "add":
            am_add = am_ref[...].astype(jnp.float32)[None]       # [1, Lq, Ls]
        elif attn_mask_mode == "fill":
            am_fill = am_ref[...][None] > 0.5                     # [1, Lq, Ls]

        def body(b, carry):
            # All heads of one batch element at once (batched MXU matmuls).
            s = jnp.einsum("hqd,hsd->hqs", q_ref[b], kt_ref[b],
                           preferred_element_type=jnp.float32) * scale
            if has_prev:
                s = s + prev_ref[b].astype(jnp.float32)
            if attn_mask_mode == "add":
                s = s + am_add
            elif attn_mask_mode == "fill":
                s = jnp.where(am_fill, -jnp.inf, s)               # masked_fill
            if has_kpm:
                kpm = kpm_ref[b][None] > 0.5                      # [1, 1, Ls]
                s = jnp.where(kpm, -jnp.inf, s)                   # masked_fill

            # Row-wise softmax in f32.  Exact division: the kernel is
            # HBM-bandwidth bound so the VALU has slack, and exactness matters
            # when attn/scores feed stacked TSTEncoderLayers.
            m = jnp.max(s, axis=-1, keepdims=True)
            e = jnp.exp(s - m)
            w = e / jnp.sum(e, axis=-1, keepdims=True)

            o = jnp.einsum("hqs,hsd->hqd", w.astype(v_ref.dtype), v_ref[b],
                           preferred_element_type=jnp.float32)

            # One full store per output per batch element (no per-head narrow
            # masked column stores).
            out_ref[b] = o.astype(out_ref.dtype)
            if with_attn:
                attn_ref[b] = w.astype(attn_ref.dtype)
            if with_scores:
                scores_ref[b] = s.astype(scores_ref.dtype)
            return carry

        # fori_loop (not a static unroll) bounds per-element live ranges.
        lax.fori_loop(0, b_blk, body, 0)

    return kernel


# ----------------------------------------------------------------------------
# VMEM sizing helpers (generation-adaptive batch blocking)
# ----------------------------------------------------------------------------
def _round_up(x, m):
    return -(-x // m) * m


def _padded_vmem_bytes(block_shape, dtype):
    """Approximate VMEM footprint of one block tile: minor dim padded to 128
    lanes, second-minor to the dtype's sublane packing (8 for f32, 16 for
    bf16, 32 for 8-bit)."""
    shape = tuple(int(d) for d in block_shape)
    if len(shape) < 2:
        shape = (1,) * (2 - len(shape)) + shape
    itemsize = jnp.dtype(dtype).itemsize
    sub = {4: 8, 2: 16, 1: 32}.get(itemsize, 8)
    lead = 1
    for d in shape[:-2]:
        lead *= d
    return lead * _round_up(shape[-2], sub) * _round_up(shape[-1], 128) * itemsize


def _vmem_capacity_bytes():
    """Per-core VMEM capacity: ~128 MiB on v5e/v6e, 64 MiB on v7x."""
    try:
        info = pltpu.get_tpu_info()
        cap = getattr(info, "vmem_capacity_bytes", None)
        if cap:
            return int(cap)
    except Exception:
        pass
    return 64 * 1024 * 1024        # conservative (v7x-safe) fallback


def _pick_batch_block(bs, per_elem_bytes, shared_bytes, budget_bytes):
    """Largest divisor of bs whose double-buffered footprint fits the budget,
    capped so the grid keeps >= 2 steps when bs >= 2 (both TensorCores get
    balanced work on megacore parts / v7x)."""
    cap = bs if bs < 2 else max(1, bs // 2)
    best = 1
    for b in range(1, cap + 1):
        if bs % b == 0 and 2 * b * per_elem_bytes + shared_bytes <= budget_bytes:
            best = b
    return best


# ----------------------------------------------------------------------------
# Public wrapper: matches `_ScaledDotProductAttention.forward`
# ----------------------------------------------------------------------------
def scaled_dot_product_attention(q, k, v, scale,
                                 prev=None,
                                 key_padding_mask=None,
                                 attn_mask=None,
                                 res_attention=False,
                                 with_attn=True,
                                 attn_dtype=jnp.float32,
                                 batch_block=None):
    """Pallas TPU implementation of the module's attention forward.

    with_attn=False compiles the attn-weights writeback out entirely (big HBM
    saving when the caller does not consume it).  attn_dtype controls the
    dtype of the attn/scores slabs (f32 default = PyTorch parity; bf16 halves
    writeback traffic).
    """
    bs, n_heads, q_len, d_k = q.shape
    seq_len = k.shape[-1]
    d_v = v.shape[-1]
    scale = float(scale)                 # lsa=False -> frozen compile-time constant
    with_scores = bool(res_attention)
    attn_dtype = jnp.dtype(attn_dtype)

    # k arrives module-style as [bs, H, d_k, seq_len]; hand the kernel the
    # [bs, H, seq_len, d_k] transpose (cheap XLA op) so both in-kernel matmuls
    # are the known-good "batch leading, contract last dims" form.
    kt = jnp.swapaxes(k, -1, -2)

    has_prev = prev is not None
    attn_mask_mode, am2d = None, None
    if attn_mask is not None:
        am2d = attn_mask.reshape(attn_mask.shape[-2], attn_mask.shape[-1])
        if attn_mask.dtype == jnp.bool_:
            attn_mask_mode = "fill"                       # masked_fill semantics
            am2d = am2d.astype(jnp.float32)
        else:
            attn_mask_mode = "add"                        # additive float mask
            am2d = am2d.astype(jnp.float32)
    has_kpm = key_padding_mask is not None
    if has_kpm:
        kpm = key_padding_mask.reshape(bs, 1, seq_len).astype(jnp.float32)

    # ---- batch-block sizing from (padded) per-element VMEM footprint -------
    per_elem = (_padded_vmem_bytes((n_heads, q_len, d_k), q.dtype) +       # q
                _padded_vmem_bytes((n_heads, seq_len, d_k), k.dtype) +     # k^T
                _padded_vmem_bytes((n_heads, seq_len, d_v), v.dtype) +     # v
                _padded_vmem_bytes((n_heads, q_len, d_v), q.dtype))        # out
    if has_prev:
        per_elem += _padded_vmem_bytes((n_heads, q_len, seq_len), prev.dtype)
    if has_kpm:
        per_elem += _padded_vmem_bytes((1, seq_len), jnp.float32)
    if with_attn:
        per_elem += _padded_vmem_bytes((n_heads, q_len, seq_len), attn_dtype)
    if with_scores:
        per_elem += _padded_vmem_bytes((n_heads, q_len, seq_len), attn_dtype)
    shared = (2 * _padded_vmem_bytes((q_len, seq_len), jnp.float32)
              if attn_mask_mode else 0)

    vmem_cap = _vmem_capacity_bytes()          # 128 MiB v5e/v6e, 64 MiB v7x
    budget = int(vmem_cap * 0.40)              # double-buffered working-set target
    if batch_block is None:
        b_blk = _pick_batch_block(bs, per_elem, shared, budget)
    else:
        b_blk = max(1, min(int(batch_block), bs))
        assert bs % b_blk == 0, "batch_block must divide bs"
    grid = (bs // b_blk,)

    needed = 2 * b_blk * per_elem + shared
    vmem_limit = int(min(0.8 * vmem_cap, max(needed + (8 << 20), 32 << 20)))

    # ---- specs --------------------------------------------------------------
    inputs = [q, kt, v]
    in_specs = [
        pl.BlockSpec((b_blk, n_heads, q_len, d_k), lambda i: (i, 0, 0, 0)),
        pl.BlockSpec((b_blk, n_heads, seq_len, d_k), lambda i: (i, 0, 0, 0)),
        pl.BlockSpec((b_blk, n_heads, seq_len, d_v), lambda i: (i, 0, 0, 0)),
    ]
    if has_prev:
        inputs.append(prev)
        in_specs.append(
            pl.BlockSpec((b_blk, n_heads, q_len, seq_len), lambda i: (i, 0, 0, 0)))
    if attn_mask_mode:
        inputs.append(am2d)
        in_specs.append(pl.BlockSpec((q_len, seq_len), lambda i: (0, 0)))
    if has_kpm:
        inputs.append(kpm)
        in_specs.append(pl.BlockSpec((b_blk, 1, seq_len), lambda i: (i, 0, 0)))

    out_shapes = [jax.ShapeDtypeStruct((bs, n_heads, q_len, d_v), q.dtype)]
    out_specs = [pl.BlockSpec((b_blk, n_heads, q_len, d_v), lambda i: (i, 0, 0, 0))]
    if with_attn:
        out_shapes.append(jax.ShapeDtypeStruct((bs, n_heads, q_len, seq_len), attn_dtype))
        out_specs.append(
            pl.BlockSpec((b_blk, n_heads, q_len, seq_len), lambda i: (i, 0, 0, 0)))
    if with_scores:
        out_shapes.append(jax.ShapeDtypeStruct((bs, n_heads, q_len, seq_len), attn_dtype))
        out_specs.append(
            pl.BlockSpec((b_blk, n_heads, q_len, seq_len), lambda i: (i, 0, 0, 0)))

    # Advisory cost estimate (lets XLA schedule W_Q/W_K/W_V/FFN around the call).
    flops = 2 * bs * n_heads * q_len * seq_len * (d_k + d_v)
    bytes_accessed = sum(int(math.prod(x.shape)) * jnp.dtype(x.dtype).itemsize
                         for x in inputs)
    bytes_accessed += sum(int(math.prod(s.shape)) * jnp.dtype(s.dtype).itemsize
                          for s in out_shapes)
    cost = pl.CostEstimate(flops=int(flops),
                           transcendentals=int(bs * n_heads * q_len * seq_len),
                           bytes_accessed=int(bytes_accessed))

    kernel = _make_sdpa_kernel(
        b_blk=b_blk, scale=scale, has_prev=has_prev,
        attn_mask_mode=attn_mask_mode, has_kpm=has_kpm,
        with_attn=with_attn, with_scores=with_scores)

    results = pl.pallas_call(
        kernel,
        out_shape=tuple(out_shapes),
        grid_spec=pltpu.PrefetchScalarGridSpec(
            num_scalar_prefetch=0,
            grid=grid,
            in_specs=in_specs,
            out_specs=tuple(out_specs)),
        compiler_params=pltpu.CompilerParams(
            dimension_semantics=("parallel",),     # batch axis shards across TCs
            vmem_limit_bytes=vmem_limit),
        cost_estimate=cost,
    )(*inputs)

    idx = 0
    output = results[idx]; idx += 1
    attn = None
    if with_attn:
        attn = results[idx]; idx += 1
    scores = results[idx] if with_scores else None

    if res_attention:
        return (output, attn, scores) if with_attn else (output, scores)
    return (output, attn) if with_attn else output


# ----------------------------------------------------------------------------
# Pure-JAX reference mirroring the PyTorch module
# ----------------------------------------------------------------------------
def _reference(q, k, v, scale, prev, key_padding_mask, attn_mask):
    scores = jnp.einsum("bhqd,bhds->bhqs", q, k,
                        preferred_element_type=jnp.float32) * scale
    if prev is not None:
        scores = scores + prev
    if attn_mask is not None:
        if attn_mask.dtype == jnp.bool_:
            scores = jnp.where(attn_mask[None], -jnp.inf, scores)
        else:
            scores = scores + attn_mask[None]
    if key_padding_mask is not None:
        scores = jnp.where(key_padding_mask[:, None, None, :], -jnp.inf, scores)
    w = jax.nn.softmax(scores, axis=-1)
    out = jnp.einsum("bhqs,bhsd->bhqd", w, v)
    return out, w, scores


if __name__ == "__main__":
    # Small config consistent with the module: d_model=32, n_heads=4, lsa=False.
    d_model, n_heads = 32, 4
    head_dim = d_model // n_heads              # d_k = d_v = 8
    scale = head_dim ** -0.5                   # frozen nn.Parameter(head_dim**-0.5)
    bs, q_len, seq_len = 4, 8, 8               # bs = batch * n_vars in PatchTST
    d_k = d_v = head_dim

    key = jax.random.PRNGKey(0)
    kq, kk, kv, kp = jax.random.split(key, 4)
    q = jax.random.normal(kq, (bs, n_heads, q_len, d_k), jnp.float32)
    k = jax.random.normal(kk, (bs, n_heads, d_k, seq_len), jnp.float32)
    v = jax.random.normal(kv, (bs, n_heads, seq_len, d_v), jnp.float32)
    prev = 0.1 * jax.random.normal(kp, (bs, n_heads, q_len, seq_len), jnp.float32)

    # key_padding_mask: mask last 2 keys of batch element 1 (bool, True = masked)
    key_padding_mask = jnp.zeros((bs, seq_len), jnp.bool_).at[1, -2:].set(True)
    # additive float attn_mask [1, q_len, seq_len]
    attn_mask_f = jnp.zeros((1, q_len, seq_len), jnp.float32).at[0, 0, 3].set(-1.0)

    # --- full res-attention path: prev + both masks, attn + scores emitted ---
    output, attn, scores = scaled_dot_product_attention(
        q, k, v, scale, prev=prev, key_padding_mask=key_padding_mask,
        attn_mask=attn_mask_f, res_attention=True)
    jax.block_until_ready((output, attn, scores))

    ref_out, ref_attn, ref_scores = _reference(
        q, k, v, scale, prev, key_padding_mask, attn_mask_f)
    assert output.shape == (bs, n_heads, q_len, d_v)
    assert attn.shape == scores.shape == (bs, n_heads, q_len, seq_len)
    assert jnp.allclose(scores, ref_scores, atol=1e-5, rtol=1e-5, equal_nan=True)
    assert jnp.allclose(attn, ref_attn, atol=1e-5, rtol=1e-5)
    assert jnp.allclose(output, ref_out, atol=1e-4, rtol=1e-5)
    assert jnp.allclose(jnp.sum(attn, axis=-1), 1.0, atol=1e-5)

    # --- standard (non-res) path: boolean attn_mask (masked_fill), no prev ---
    bool_mask = jnp.zeros((1, q_len, seq_len), jnp.bool_).at[0, :, 0].set(True)
    out2, attn2 = scaled_dot_product_attention(
        q, k, v, scale, attn_mask=bool_mask, res_attention=False)
    jax.block_until_ready((out2, attn2))
    r_out2, r_attn2, _ = _reference(q, k, v, scale, None, None, bool_mask)
    assert jnp.allclose(attn2, r_attn2, atol=1e-5, rtol=1e-5)
    assert jnp.allclose(out2, r_out2, atol=1e-4, rtol=1e-5)

    # --- output-only path: attn writeback compiled out (bandwidth saver) -----
    out3 = scaled_dot_product_attention(q, k, v, scale,
                                        res_attention=False, with_attn=False)
    jax.block_until_ready(out3)
    r_out3, _, _ = _reference(q, k, v, scale, None, None, None)
    assert jnp.allclose(out3, r_out3, atol=1e-4, rtol=1e-5)

    print("KERNEL_OK")
</pallas_src>

<mosaic_0001>
module attributes {stable_mosaic.version = 11 : i64} {
  func.func @kernel(%arg0: i32, %arg1: memref<2x4x8x8xf32, #tpu.memory_space<vmem>>, %arg2: memref<2x4x8x8xf32, #tpu.memory_space<vmem>>, %arg3: memref<2x4x8x8xf32, #tpu.memory_space<vmem>>, %arg4: memref<2x4x8x8xf32, #tpu.memory_space<vmem>>, %arg5: memref<8x8xf32, #tpu.memory_space<vmem>>, %arg6: memref<2x1x8xf32, #tpu.memory_space<vmem>>, %arg7: memref<2x4x8x8xf32, #tpu.memory_space<vmem>>, %arg8: memref<2x4x8x8xf32, #tpu.memory_space<vmem>>, %arg9: memref<2x4x8x8xf32, #tpu.memory_space<vmem>>) attributes {dimension_semantics = [#tpu.dimension_semantics<parallel>], iteration_bounds = array<i64: 2>, scalar_prefetch = 0 : i64, scratch_operands = 0 : i64, tpu.core_type = #tpu.core_type<tc>, window_params = [{transform_indices = @transform_0, window_bounds = array<i64: 2, 4, 8, 8>}, {transform_indices = @transform_1, window_bounds = array<i64: 2, 4, 8, 8>}, {transform_indices = @transform_2, window_bounds = array<i64: 2, 4, 8, 8>}, {transform_indices = @transform_3, window_bounds = array<i64: 2, 4, 8, 8>}, {pipeline_mode = #tpu.pipeline_mode<synchronous>, transform_indices = @transform_4, window_bounds = array<i64: 8, 8>}, {transform_indices = @transform_5, window_bounds = array<i64: 2, 1, 8>}, {transform_indices = @transform_6, window_bounds = array<i64: 2, 4, 8, 8>}, {transform_indices = @transform_7, window_bounds = array<i64: 2, 4, 8, 8>}, {transform_indices = @transform_8, window_bounds = array<i64: 2, 4, 8, 8>}]} {
    %c0 = arith.constant 0 : index
    %c0_0 = arith.constant 0 : index
    %0 = vector.load %arg5[%c0, %c0_0] : memref<8x8xf32, #tpu.memory_space<vmem>>, vector<8x8xf32>
    %1 = vector.shape_cast %0 : vector<8x8xf32> to vector<1x8x8xf32>
    %c0_i32 = arith.constant 0 : i32
    %c2_i32 = arith.constant 2 : i32
    %2 = arith.addi %c0_i32, %c2_i32 : i32
    %c1_i32 = arith.constant 1 : i32
    scf.for %arg10 = %c0_i32 to %2 step %c1_i32  : i32 {
      %3 = arith.index_cast %arg10 : i32 to index
      %c0_2 = arith.constant 0 : index
      %c0_3 = arith.constant 0 : index
      %c0_4 = arith.constant 0 : index
      %4 = vector.load %arg1[%3, %c0_2, %c0_3, %c0_4] : memref<2x4x8x8xf32, #tpu.memory_space<vmem>>, vector<1x4x8x8xf32>
      %5 = vector.shape_cast %4 : vector<1x4x8x8xf32> to vector<4x8x8xf32>
      %6 = arith.index_cast %arg10 : i32 to index
      %c0_5 = arith.constant 0 : index
      %c0_6 = arith.constant 0 : index
      %c0_7 = arith.constant 0 : index
      %7 = vector.load %arg2[%6, %c0_5, %c0_6, %c0_7] : memref<2x4x8x8xf32, #tpu.memory_space<vmem>>, vector<1x4x8x8xf32>
      %8 = vector.shape_cast %7 : vector<1x4x8x8xf32> to vector<4x8x8xf32>
      "tpu.trace_start"() <{level = 10 : i32, message = "hqd,hsd->hqs"}> : () -> ()
      %cst = arith.constant dense<0.000000e+00> : vector<4x8x8xf32>
      %9 = tpu.matmul %5, %8, %cst {dimension_numbers = #tpu.dot_dimension_numbers<[2], [2], [1], [1], [0, 0, 0, 1, 1, 1], [0], [0]>} : vector<4x8x8xf32>, vector<4x8x8xf32>, vector<4x8x8xf32> -> vector<4x8x8xf32>
      "tpu.trace_stop"() : () -> ()
      %cst_8 = arith.constant 0.353553385 : f32
      %10 = vector.broadcast %cst_8 : f32 to vector<4x8x8xf32>
      %11 = arith.mulf %9, %10 : vector<4x8x8xf32>
      %12 = arith.index_cast %arg10 : i32 to index
      %c0_9 = arith.constant 0 : index
      %c0_10 = arith.constant 0 : index
      %c0_11 = arith.constant 0 : index
      %13 = vector.load %arg4[%12, %c0_9, %c0_10, %c0_11] : memref<2x4x8x8xf32, #tpu.memory_space<vmem>>, vector<1x4x8x8xf32>
      %14 = vector.shape_cast %13 : vector<1x4x8x8xf32> to vector<4x8x8xf32>
      %15 = arith.addf %11, %14 : vector<4x8x8xf32>
      %16 = vector.broadcast %1 : vector<1x8x8xf32> to vector<4x8x8xf32>
      %17 = arith.addf %15, %16 : vector<4x8x8xf32>
      %18 = arith.index_cast %arg10 : i32 to index
      %c0_12 = arith.constant 0 : index
      %c0_13 = arith.constant 0 : index
      %19 = vector.load %arg6[%18, %c0_12, %c0_13] : memref<2x1x8xf32, #tpu.memory_space<vmem>>, vector<1x1x8xf32>
      %20 = vector.shape_cast %19 : vector<1x1x8xf32> to vector<1x8xf32>
      %21 = vector.shape_cast %20 : vector<1x8xf32> to vector<1x1x8xf32>
      %cst_14 = arith.constant 5.000000e-01 : f32
      %22 = vector.broadcast %cst_14 : f32 to vector<1x1x8xf32>
      %23 = arith.cmpf ogt, %21, %22 : vector<1x1x8xf32>
      %cst_15 = arith.constant 0xFF800000 : f32
      %24 = vector.shape_cast %23 : vector<1x1x8xi1> to vector<1x1x8xi1>
      %25 = vector.broadcast %24 : vector<1x1x8xi1> to vector<4x8x8xi1>
      %26 = vector.broadcast %cst_15 : f32 to vector<4x8x8xf32>
      %27 = arith.select %25, %26, %17 : vector<4x8x8xi1>, vector<4x8x8xf32>
      %cst_16 = arith.constant dense<0xFF800000> : vector<4x8xf32>
      %28 = vector.multi_reduction <maximumf>, %27, %cst_16 [2] : vector<4x8x8xf32> to vector<4x8xf32>
      %29 = vector.shape_cast %28 : vector<4x8xf32> to vector<4x8x1xf32>
      %30 = vector.broadcast %29 : vector<4x8x1xf32> to vector<4x8x8xf32>
      %31 = arith.subf %27, %30 : vector<4x8x8xf32>
      %32 = math.exp %31 : vector<4x8x8xf32>
      %cst_17 = arith.constant dense<0.000000e+00> : vector<4x8xf32>
      %33 = vector.multi_reduction <add>, %32, %cst_17 [2] : vector<4x8x8xf32> to vector<4x8xf32>
      %34 = vector.shape_cast %33 : vector<4x8xf32> to vector<4x8x1xf32>
      %35 = vector.broadcast %34 : vector<4x8x1xf32> to vector<4x8x8xf32>
      %36 = arith.divf %32, %35 : vector<4x8x8xf32>
      %37 = arith.index_cast %arg10 : i32 to index
      %c0_18 = arith.constant 0 : index
      %c0_19 = arith.constant 0 : index
      %c0_20 = arith.constant 0 : index
      %38 = vector.load %arg3[%37, %c0_18, %c0_19, %c0_20] : memref<2x4x8x8xf32, #tpu.memory_space<vmem>>, vector<1x4x8x8xf32>
      %39 = vector.shape_cast %38 : vector<1x4x8x8xf32> to vector<4x8x8xf32>
      "tpu.trace_start"() <{level = 10 : i32, message = "hqs,hsd->hqd"}> : () -> ()
      %cst_21 = arith.constant dense<0.000000e+00> : vector<4x8x8xf32>
      %40 = tpu.matmul %36, %39, %cst_21 {dimension_numbers = #tpu.dot_dimension_numbers<[2], [1], [1], [2], [0, 0, 0, 1, 1, 2], [0], [0]>} : vector<4x8x8xf32>, vector<4x8x8xf32>, vector<4x8x8xf32> -> vector<4x8x8xf32>
      "tpu.trace_stop"() : () -> ()
      %41 = arith.index_cast %arg10 : i32 to index
      %c0_22 = arith.constant 0 : index
      %c0_23 = arith.constant 0 : index
      %c0_24 = arith.constant 0 : index
      %42 = vector.load %arg7[%41, %c0_22, %c0_23, %c0_24] : memref<2x4x8x8xf32, #tpu.memory_space<vmem>>, vector<1x4x8x8xf32>
      %43 = vector.shape_cast %42 : vector<1x4x8x8xf32> to vector<4x8x8xf32>
      %44 = vector.shape_cast %40 : vector<4x8x8xf32> to vector<1x4x8x8xf32>
      tpu.vector_store %arg7[%41, %c0_22, %c0_23, %c0_24], %44 {strides = array<i32>} : memref<2x4x8x8xf32, #tpu.memory_space<vmem>>, vector<1x4x8x8xf32>,
      %45 = arith.index_cast %arg10 : i32 to index
      %c0_25 = arith.constant 0 : index
      %c0_26 = arith.constant 0 : index
      %c0_27 = arith.constant 0 : index
      %46 = vector.load %arg8[%45, %c0_25, %c0_26, %c0_27] : memref<2x4x8x8xf32, #tpu.memory_space<vmem>>, vector<1x4x8x8xf32>
      %47 = vector.shape_cast %46 : vector<1x4x8x8xf32> to vector<4x8x8xf32>
      %48 = vector.shape_cast %36 : vector<4x8x8xf32> to vector<1x4x8x8xf32>
      tpu.vector_store %arg8[%45, %c0_25, %c0_26, %c0_27], %48 {strides = array<i32>} : memref<2x4x8x8xf32, #tpu.memory_space<vmem>>, vector<1x4x8x8xf32>,
      %49 = arith.index_cast %arg10 : i32 to index
      %c0_28 = arith.constant 0 : index
      %c0_29 = arith.constant 0 : index
      %c0_30 = arith.constant 0 : index
      %50 = vector.load %arg9[%49, %c0_28, %c0_29, %c0_30] : memref<2x4x8x8xf32, #tpu.memory_space<vmem>>, vector<1x4x8x8xf32>
      %51 = vector.shape_cast %50 : vector<1x4x8x8xf32> to vector<4x8x8xf32>
      %52 = vector.shape_cast %27 : vector<4x8x8xf32> to vector<1x4x8x8xf32>
      tpu.vector_store %arg9[%49, %c0_28, %c0_29, %c0_30], %52 {strides = array<i32>} : memref<2x4x8x8xf32, #tpu.memory_space<vmem>>, vector<1x4x8x8xf32>,
    }
    %c2_i32_1 = arith.constant 2 : i32
    return
  }
  func.func @transform_0(%arg0: i32) -> (i32, i32, i32, i32) {
    %c0_i32 = arith.constant 0 : i32
    %c0_i32_0 = arith.constant 0 : i32
    %c0_i32_1 = arith.constant 0 : i32
    %c0_i32_2 = arith.constant 0 : i32
    return %arg0, %c0_i32, %c0_i32_0, %c0_i32_1 : i32, i32, i32, i32
  }
  func.func @transform_1(%arg0: i32) -> (i32, i32, i32, i32) {
    %c0_i32 = arith.constant 0 : i32
    %c0_i32_0 = arith.constant 0 : i32
    %c0_i32_1 = arith.constant 0 : i32
    %c0_i32_2 = arith.constant 0 : i32
    return %arg0, %c0_i32, %c0_i32_0, %c0_i32_1 : i32, i32, i32, i32
  }
  func.func @transform_2(%arg0: i32) -> (i32, i32, i32, i32) {
    %c0_i32 = arith.constant 0 : i32
    %c0_i32_0 = arith.constant 0 : i32
    %c0_i32_1 = arith.constant 0 : i32
    %c0_i32_2 = arith.constant 0 : i32
    return %arg0, %c0_i32, %c0_i32_0, %c0_i32_1 : i32, i32, i32, i32
  }
  func.func @transform_3(%arg0: i32) -> (i32, i32, i32, i32) {
    %c0_i32 = arith.constant 0 : i32
    %c0_i32_0 = arith.constant 0 : i32
    %c0_i32_1 = arith.constant 0 : i32
    %c0_i32_2 = arith.constant 0 : i32
    return %arg0, %c0_i32, %c0_i32_0, %c0_i32_1 : i32, i32, i32, i32
  }
  func.func @transform_4(%arg0: i32) -> (i32, i32) {
    %c0_i32 = arith.constant 0 : i32
    %c0_i32_0 = arith.constant 0 : i32
    %c0_i32_1 = arith.constant 0 : i32
    return %c0_i32, %c0_i32_0 : i32, i32
  }
  func.func @transform_5(%arg0: i32) -> (i32, i32, i32) {
    %c0_i32 = arith.constant 0 : i32
    %c0_i32_0 = arith.constant 0 : i32
    %c0_i32_1 = arith.constant 0 : i32
    return %arg0, %c0_i32, %c0_i32_0 : i32, i32, i32
  }
  func.func @transform_6(%arg0: i32) -> (i32, i32, i32, i32) {
    %c0_i32 = arith.constant 0 : i32
    %c0_i32_0 = arith.constant 0 : i32
    %c0_i32_1 = arith.constant 0 : i32
    %c0_i32_2 = arith.constant 0 : i32
    return %arg0, %c0_i32, %c0_i32_0, %c0_i32_1 : i32, i32, i32, i32
  }
  func.func @transform_7(%arg0: i32) -> (i32, i32, i32, i32) {
    %c0_i32 = arith.constant 0 : i32
    %c0_i32_0 = arith.constant 0 : i32
    %c0_i32_1 = arith.constant 0 : i32
    %c0_i32_2 = arith.constant 0 : i32
    return %arg0, %c0_i32, %c0_i32_0, %c0_i32_1 : i32, i32, i32, i32
  }
  func.func @transform_8(%arg0: i32) -> (i32, i32, i32, i32) {
    %c0_i32 = arith.constant 0 : i32
    %c0_i32_0 = arith.constant 0 : i32
    %c0_i32_1 = arith.constant 0 : i32
    %c0_i32_2 = arith.constant 0 : i32
    return %arg0, %c0_i32, %c0_i32_0, %c0_i32_1 : i32, i32, i32, i32
  }
}

</mosaic_0001>

<bundles_post_ra>
// kernel: tpu_custom_call.1
= control target key start
LH: loop header
LB: loop body
LE: loop exit
PB: predicated region body
PF: predicated region fallthrough
CT: control target
= control target key end

     0   :  { %s2117_s0 = inlined_call_operand.hbm [shape: f32[4,4,8,8], index: 0, kind: input, shape index: {}]   ;;  %s2118_s1 = inlined_call_operand.hbm [shape: f32[4,4,8,8], index: 1, kind: input, shape index: {}]   ;;  %s2119_s2 = inlined_call_operand.hbm [shape: f32[4,4,8,8], index: 2, kind: input, shape index: {}]   ;;  %s2120_s3 = inlined_call_operand.hbm [shape: f32[4,4,8,8], index: 3, kind: input, shape index: {}]   ;;  %s2121_s4 = inlined_call_operand.hbm [shape: f32[8,8], index: 4, kind: input, shape index: {}]   ;;  %s2122_s5 = inlined_call_operand.vmem [shape: f32[4,1,8], index: 5, kind: input, shape index: {}]   ;;  %s2123_s6 = inlined_call_operand.hbm [shape: f32[4,4,8,8], index: 6, kind: output, shape index: {0}]   ;;  %s2124_s7 = inlined_call_operand.hbm [shape: f32[4,4,8,8], index: 7, kind: output, shape index: {1}]   ;;  %s2125_s8 = inlined_call_operand.hbm [shape: f32[4,4,8,8], index: 8, kind: output, shape index: {2}]  }
   0x1   :  { %2137 = sst [smem:[#allocation25_spill]] %s2117_s0 }
   0x2   :  { %2138 = sst [smem:[#allocation26_spill]] %s2118_s1 }
   0x3   :  { %2139 = sst [smem:[#allocation27_spill]] %s2121_s4 }
   0x4   :  { %2140 = sst [smem:[#allocation28_spill]] %s2125_s8 }
   0x5   :  { %14 = vsyncpa [#allocation3], 0 }
   0x6   :  { %16 = vsyncpa [#allocation3 + $0x1], 0 }
   0x7   :  { %17 = vsyncpa [#allocation6], 0 }
   0x8   :  { %19 = vsyncpa [#allocation6 + $0x1], 0 }
   0x9   :  { %20 = vsyncpa [#allocation9], 0 }
   0xa   :  { %22 = vsyncpa [#allocation9 + $0x1], 0 }
   0xb   :  { %23 = vsyncpa [#allocation4], 0 }
   0xc   :  { %25 = vsyncpa [#allocation4 + $0x1], 0 }
   0xd   :  { %26 = vsyncpa [#allocation13], 0 }
   0xe   :  { %28 = vsyncpa [#allocation13 + $0x1], 0  ;;  %s1703_s27 = smov 0   ;;  %s1705_s28 = smov 0  }
   0xf   :  { %s1707_s29 = smov 0   ;;  %s1709_s30 = smov 0  }
  0x10 LB: > { %2141 = sst [smem:[#allocation21_spill]] %s1634_s27  ;;  %s1724_s9 = sadd.s32 4294967295, %s1646_s30   ;;  %s1646_s30 = sphi %s1709_s30, %s2165_s30   ;;  %s1642_s29 = sphi %s1707_s29, %s2169_s29   ;;  %s1638_s28 = sphi %s1705_s28, %s2168_s28   ;;  %s1634_s27 = sphi %s1703_s27, %s2167_s27  }
  0x11   : > { %s2126_s10 = sadd.s32 4294967294, %s1646_s30   ;;  %s1728_s11 = sadd.s32 1, %s1646_s30  }
  0x12   : > { %2142 = sst [smem:[#allocation22_spill]] %s1728_s11  ;;  %s41_s12 = sadd.s32 1, %s1642_s29 }
  0x13   : > { %s38_s13 = ssub.s32 %s1646_s30, %s1728_s11  ;;  %p48_p0 = scmp.ne.s32.totalorder %s1642_s29, %s1638_s28 }
  0x14   : > { %p39_p1 = scmp.eq.s32.totalorder %s38_s13, 0  ;;  %p49_p2 = scmp.eq.s32.totalorder %s1646_s30, 0 }
  0x15   : > { %p54_p3 = scmp.ne.s32.totalorder %s1638_s28, %s1634_s27  ;;  %p55_p4 = scmp.eq.s32.totalorder %s1724_s9, 0 }
  0x16   : > { %s1740_s14 = scalar_select %p39_p1, %s1642_s29, %s41_s12  }
  0x17   : > { %p1742_p5 = por %p49_p2, %p48_p0  ;;  %p1748_p6 = por %p55_p4, %p54_p3 }
  0x18   : > { %2143 = sst [smem:[#allocation23_spill]] %s1740_s14  ;;  %p203_p7 = scmp.eq.s32.totalorder %s1724_s9, 1 }
  0x19   : > { %p209_p8 = scmp.eq.s32.totalorder %s2126_s10, 1  ;;  %p1173_p9 = scmp.ge.s32.totalorder %s1646_s30, 1 }
  0x1a   : > { %p268_p10 = scmp.lt.s32.totalorder %s1646_s30, 3  ;;  %p1757_p11 = por %p203_p7, %p48_p0 }
  0x1b   : > { %p1761_p12 = por %p209_p8, %p54_p3  ;;  %s2150_s4 = sld [smem:[#allocation27_spill]] }
  0x1c   : > { %p1765_p13 = pnand %p1173_p9, %p268_p10  ;;  %s1652_s23 = smov [#allocation10]  }
  0x1d   : > { %s2147_s18 = scalar_select %p1761_p12, 1, 0 }
  0x1e   : > { %p1261_p0 = pneg %p1765_p13  ;;  %s282_s24 = sshll.u32 %s1652_s23, 4  ;;  %s283_s24 = int_to_ptr.vmem [resolvable:$true] %s282_s24 }
  0x1f   : > { %2148 = sst [smem:[#allocation24_spill]] %s2147_s18  ;;  %p1289_p3 = scmp.lt.s32.totalorder %s1646_s30, 2 }
  0x20   : > { %p1262_p2 = pnand %p1261_p0, %p55_p4  ;;  %s2127_s25 = sand.u32 1, %s1642_s29  }
  0x21   : > { %s280_s22 = sshll.u32 %s2150_s4, 4  ;;  %s1781_s26 = sshll.u32 %s2127_s25, 6  ;;  %s281_s22 = int_to_ptr.hbm [resolvable:$true] %s280_s22 }
  0x22   : > { %1264 = dma.hbm_to_vmem [thread:$0]  (!%p1262_p2), %s281_s22, 128, %s283_s24, [#allocation9]  }
  0x23   : > { %p1785_p7 = pnand %p1289_p3, %p1742_p5  ;;  %s1790_s13 = sshll.u32 %s1646_s30, 6 }
  0x24   : > { %s2130_s20 = sand.u32 1, %s1646_s30   ;;  %s2152_s1 = sld [smem:[#allocation26_spill]] }
  0x25   : > { %s320_s4 = scalar_lea.vmem [#allocation5], %s1781_s26  ;;  %s1800_s15 = scalar_lea.sflag [#allocation6], %s2130_s20 }
  0x26   : > { %s329_s25 = sshll.u32 %s320_s4, 4  ;;  %p1388_p8 = pneg %p1785_p7  ;;  %s330_s25 = int_to_ptr.vmem [resolvable:$true] %s329_s25 }
  0x2a   : > { %s326_s10 = scalar_lea.hbm %s2152_s1, %s1790_s13  ;;  %s1391_s4 = scalar_lea.hbm %s2152_s1, 128 }
  0x2b   : > { %s327_s14 = sshll.u32 %s326_s10, 4  ;;  %s328_s14 = int_to_ptr.hbm [resolvable:$true] %s327_s14 }
  0x2c   : > { %s1384_s22 = sshra.s32 %s328_s14, 4  ;;  %s1385_s22 = int_to_ptr.hbm [resolvable:$true] %s1384_s22 }
  0x2d   : > { %s1386_s24 = scalar_lea.hbm %s1385_s22, 64  ;;  %p1392_p0 = scmp.lt.s32.totalorder %s1385_s22, %s2152_s1 }
  0x2e   : > { %p1387_p5 = scmp.ne.s32.totalorder %s1385_s22, %s1386_s24  ;;  %p1393_p2 = scmp.lt.s32.totalorder %s1391_s4, %s1386_s24 }
  0x30   : > { %p1389_p9 = pnand %p1388_p8, %p1387_p5  ;;  %p1394_p3 = por %p1393_p2, %p1392_p0 }
  0x32   : > { %p1390_p10 = pneg %p1389_p9 }
  0x34   : > { %p1395_p1 = pnand %p1394_p3, %p1390_p10 }
  0x36   : > { %1398 = shalt.err (!%p1395_p1)
}
  0x37   : > { %s2134_s20 = smov 128   ;;  %s1654_s18 = smov 8  }
  0x38   : > { %1271 = dma.hbm_to_vmem [thread:$0]  (!%p1785_p7), %s328_s14, 1024, %s330_s25, %s1800_s15, %s2134_s20, %s2134_s20, %s1654_s18  }
  0x39   : > { %s2153_s0 = sld [smem:[#allocation25_spill]]  ;;  %s297_s24 = scalar_lea.vmem [#allocation2], %s1781_s26 }
  0x3a   : > { %s306_s23 = sshll.u32 %s297_s24, 4  ;;  %s2154_s10 = sand.u32 1, %s1642_s29   ;;  %s307_s23 = int_to_ptr.vmem [resolvable:$true] %s306_s23 }
  0x3b   : > { %s294_s1 = scalar_lea.sflag [#allocation3], %s2154_s10 }
  0x3f   : > { %s303_s22 = scalar_lea.hbm %s2153_s0, %s1790_s13  ;;  %s1421_s21 = scalar_lea.hbm %s2153_s0, 128 }
  0x40   : > { %s304_s4 = sshll.u32 %s303_s22, 4  ;;  %s305_s4 = int_to_ptr.hbm [resolvable:$true] %s304_s4 }
  0x41   : > { %s1414_s27 = sshra.s32 %s305_s4, 4  ;;  %s1415_s27 = int_to_ptr.hbm [resolvable:$true] %s1414_s27 }
  0x42   : > { %s1416_s8 = scalar_lea.hbm %s1415_s27, 64  ;;  %p1422_p10 = scmp.lt.s32.totalorder %s1415_s27, %s2153_s0 }
  0x43   : > { %p1417_p1 = scmp.ne.s32.totalorder %s1415_s27, %s1416_s8  ;;  %p1423_p0 = scmp.lt.s32.totalorder %s1421_s21, %s1416_s8 }
  0x45   : > { %p1419_p5 = pnand %p1417_p1, %p1388_p8  ;;  %p1424_p2 = por %p1423_p0, %p1422_p10 }
  0x47   : > { %p1420_p9 = pneg %p1419_p5 }
  0x49   : > { %p1425_p3 = pnand %p1424_p2, %p1420_p9 }
  0x4b   : > { %1428 = shalt.err (!%p1425_p3)
}
  0x4c   : > { %s2155_s22 = smov 128   ;;  %s349_s14 = scalar_lea.hbm %s2119_s2, %s1790_s13 }
  0x4d   : > { %1268 = dma.hbm_to_vmem [thread:$0]  (!%p1785_p7), %s305_s4, 1024, %s307_s23, %s294_s1, %s2155_s22, %s2155_s22, %s1654_s18  }
  0x4e   : > { %s343_s25 = scalar_lea.vmem [#allocation7], %s1781_s26  ;;  %s350_s27 = sshll.u32 %s349_s14, 4  ;;  %s351_s27 = int_to_ptr.hbm [resolvable:$true] %s350_s27 }
  0x4f   : > { %s352_s20 = sshll.u32 %s343_s25, 4  ;;  %s1444_s8 = sshra.s32 %s351_s27, 4  ;;  %s353_s20 = int_to_ptr.vmem [resolvable:$true] %s352_s20  ;;  %s1445_s8 = int_to_ptr.hbm [resolvable:$true] %s1444_s8 }
  0x50   : > { %s1446_s21 = scalar_lea.hbm %s1445_s8, 64  ;;  %s1451_s1 = scalar_lea.hbm %s2119_s2, 128 }
  0x51   : > { %p1447_p1 = scmp.ne.s32.totalorder %s1445_s8, %s1446_s21  ;;  %p1452_p10 = scmp.lt.s32.totalorder %s1445_s8, %s2119_s2 }
  0x52   : > { %p1453_p0 = scmp.lt.s32.totalorder %s1451_s1, %s1446_s21 }
  0x53   : > { %p1449_p5 = pnand %p1447_p1, %p1388_p8 }
  0x54   : > { %p1454_p2 = por %p1453_p0, %p1452_p10 }
  0x55   : > { %p1450_p9 = pneg %p1449_p5 }
  0x57   : > { %p1455_p3 = pnand %p1454_p2, %p1450_p9 }
  0x59   : > { %1458 = shalt.err (!%p1455_p3)
}
  0x5a   : > { %1274 = dma.hbm_to_vmem [thread:$0]  (!%p1785_p7), %s351_s27, 1024, %s353_s20, %s1800_s15, %s2155_s22, %s2155_s22, %s1654_s18  }
  0x5b   : > { %s372_s10 = scalar_lea.hbm %s2120_s3, %s1790_s13  ;;  %s366_s14 = scalar_lea.vmem [#allocation8], %s1781_s26 }
  0x5c   : > { %s375_s25 = sshll.u32 %s366_s14, 4  ;;  %s373_s8 = sshll.u32 %s372_s10, 4  ;;  %s376_s25 = int_to_ptr.vmem [resolvable:$true] %s375_s25  ;;  %s374_s8 = int_to_ptr.hbm [resolvable:$true] %s373_s8 }
  0x5d   : > { %s2156_s21 = sand.u32 1, %s1646_s30   ;;  %s1474_s1 = sshra.s32 %s374_s8, 4  ;;  %s1475_s1 = int_to_ptr.hbm [resolvable:$true] %s1474_s1 }
  0x5e   : > { %s363_s11 = scalar_lea.sflag [#allocation9], %s2156_s21  ;;  %s1476_s23 = scalar_lea.hbm %s1475_s1, 64 }
  0x5f   : > { %p1477_p1 = scmp.ne.s32.totalorder %s1475_s1, %s1476_s23  ;;  %s1481_s27 = scalar_lea.hbm %s2120_s3, 128 }
  0x60   : > { %p1482_p10 = scmp.lt.s32.totalorder %s1475_s1, %s2120_s3  ;;  %p1483_p0 = scmp.lt.s32.totalorder %s1481_s27, %s1476_s23 }
  0x61   : > { %p1479_p5 = pnand %p1477_p1, %p1388_p8 }
  0x62   : > { %p1484_p2 = por %p1483_p0, %p1482_p10 }
  0x63   : > { %p1480_p9 = pneg %p1479_p5 }
  0x65   : > { %p1485_p3 = pnand %p1484_p2, %p1480_p9 }
  0x67   : > { %1488 = shalt.err (!%p1485_p3)
}
  0x68   : > { %1277 = dma.hbm_to_vmem [thread:$0]  (!%p1785_p7), %s374_s8, 1024, %s376_s25, %s363_s11, %s2155_s22, %s2155_s22, %s1654_s18  }
  0x69   : > { %395 = sbr.rel (%p1765_p13) target bundleno = 713 (0x2c9), region = 44  ;;  %s1884_s4 = sand.u32 (!%p1765_p13), 1, %s1638_s28  }
  0x6a   : > { %s1887_s0 = sshll.u32 (!%p1765_p13), %s1884_s4, 6  ;;  %s398_s24 = scalar_lea.sflag (!%p1765_p13), [#allocation3], %s1884_s4 }
  0x6b   : > { %s401_s10 = scalar_lea.vmem (!%p1765_p13), [#allocation2], %s1887_s0 }
  0x6e   : > { %1609 = dma.done.wait (%p1748_p6), %s398_s24, 1024  }
  0x6f   : > { %1611 = vsyncadd (%p1748_p6), %s398_s24, 4294966272  ;;  %s1896_s18 = sand.u32 1, %s1724_s9   ;;  %s411_s12 = scalar_lea.vmem [#allocation5], %s1887_s0 }
  0x70   : > { %s408_s19 = scalar_lea.sflag [#allocation6], %s1896_s18 }
  0x71   : > { %1613 = dma.done.wait (%p1748_p6), %s408_s19, 2048  }
  0x72   : > { %1615 = vsyncadd (%p1748_p6), %s408_s19, 4294965248  ;;  %s421_s22 = scalar_lea.vmem [#allocation7], %s1887_s0  ;;  %s428_s14 = scalar_lea.sflag [#allocation9], %s1896_s18 }
  0x73   : > { %s431_s25 = scalar_lea.vmem [#allocation8], %s1887_s0 }
  0x74   : > { %1617 = dma.done.wait (%p1748_p6), %s428_s14, 1024  }
  0x75   : > { %1619 = vsyncadd (%p1748_p6), %s428_s14, 4294966272 }
  0x76   : > { %1621 = dma.done.wait (%p55_p4), [#allocation9], 128  }
  0x77   : > { %1623 = vsyncadd (%p55_p4), [#allocation9], 4294967168  ;;  %s1201_s8 = sshll.u32 %s1724_s9, 1  ;;  %v1922_v0 = vld [vmem:[#allocation10] sm:$0xff]  ;;  %s484_s1 = scalar_lea.vmem [#allocation11], %s1887_s0 }
  0x78   : > { %p504_p13 = scmp.lt.s32.totalorder %s1201_s8, 3  ;;  %s491_s23 = scalar_lea.vmem [#allocation12], %s1887_s0 }
  0x79   : > { %s2136_s15 = scalar_lea.vmem [#allocation14], %s1887_s0  ;;  %s1927_s20 = smov 0  }
  0x7a   : > { %s2171_s8 = smov (!%p504_p13, %s1201_s8), 3 }
  0x7b   : > { %s506_s16 = scalar_lea.vmem %s2122_s5, %s2171_s8 }
  0x7c LB: >> { %s1933_s27 = sshll.u32 %s1650_s20, 5  ;;  %vm529_vm0 = vcmask 64512   ;;  %s651_s14 = scalar_lea.vmem %s506_s16, %s1650_s20  ;;  %v1655_v10 = vmov 0   ;;  %s1650_s20 = sphi %s1927_s20, %s517_s20  }
  0x7d   : >> { %s524_s13 = scalar_lea.vmem %s411_s12, %s1933_s27 [#allocation5]  ;;  %s519_s26 = scalar_lea.vmem %s401_s10, %s1933_s27 [#allocation2]  ;;  %v652_v9 = vld [vmem:[%s651_s14] sm:$0x1] }
  0x7e   : >> { %v525_v1 = vld [vmem:[%s524_s13] sm:$0xff]  ;;  %v527_v2 = vld [vmem:[%s524_s13 + $0x10] sm:$0xff]  ;;  %v526_v5 = vld [vmem:[%s524_s13 + $0x8] sm:$0xff]  ;;  %vm653_vm1 = vcmp.gt.f32.partialorder %v652_v9, 0.5  ;;  %s638_s21 = scalar_lea.vmem %s431_s25, %s1933_s27 [#allocation8]  ;;  %s864_s11 = scalar_lea.vmem %s2136_s15, %s1933_s27 [#allocation14] }
  0x7f   : >> { %v520_v3 = vld [vmem:[%s519_s26] sm:$0xff]  ;;  %1203 = vmatpush.xpose.msk.msra.mxu0 %vm529_vm0, %v525_v1  ;;  %1207 = vmatpush.xpose.msk.msra.mxu2 %vm529_vm0, %v527_v2  ;;  %v522_v4 = vld [vmem:[%s519_s26 + $0x10] sm:$0xff]  ;;  %v528_v6 = vld [vmem:[%s524_s13 + $0x18] sm:$0xff]  ;;  %v654_v11 = vsel %vm653_vm1, 1, %v1655_v10  ;;  %s757_s13 = scalar_lea.vmem %s421_s22, %s1933_s27 [#allocation7]  ;;  %s854_s24 = scalar_lea.vmem %s484_s1, %s1933_s27 [#allocation11] }
  0x80   : >> { %1205 = vmatpush.xpose.msk.msra.mxu1 %vm529_vm0, %v526_v5  ;;  %1209 = vmatpush.xpose.msk.msra.mxu3 %vm529_vm0, %v528_v6  ;;  %v521_v7 = vld [vmem:[%s519_s26 + $0x8] sm:$0xff]  ;;  %v523_v8 = vld [vmem:[%s519_s26 + $0x18] sm:$0xff]  ;;  %v639_v13 = vld [vmem:[%s638_s21] sm:$0xff]  ;;  %v655_v14 = vperm.slane %v654_v11, 0  ;;  %s2004_s26 = scalar_lea.vmem %s491_s23, %s1933_s27 [#allocation12]  ;;  %s517_s20 = sadd.s32 1, %s1650_s20  }
  0x81   : >> { %v640_v17 = vld [vmem:[%s638_s21 + $0x8] sm:$0xff]  ;;  %v641_v24 = vld [vmem:[%s638_s21 + $0x10] sm:$0xff]  ;;  %v642_v29 = vld [vmem:[%s638_s21 + $0x18] sm:$0xff]  ;;  %p514_p4 = scmp.ge.s32.totalorder %s517_s20, 2  }
  0x82   : >> { %1204 = vmatmul.msk.f32.vlgmr.msra.gmra.mxu0 %vm529_vm0, %v520_v3  ;;  %1208 = vmatmul.msk.f32.vlgmr.msra.gmra.mxu2 %vm529_vm0, %v522_v4  ;;  %vm1958_vm2 = vcmp.eq.s32.totalorder %v655_v14, 1  ;;  %v758_v62 = vld [vmem:[%s757_s13] sm:$0xff]  ;;  %v760_v63 = vld [vmem:[%s757_s13 + $0x10] sm:$0xff]  ;;  %v759_v1 = vld [vmem:[%s757_s13 + $0x8] sm:$0xff]  ;;  %s2032_s27 = sshll.u32 (%p514_p4), %s1724_s9, 6  ;;  %s1524_s12 = scalar_lea.hbm (%p514_p4), %s2124_s7, 128 }
  0x83   : >> { %1206 = vmatmul.msk.f32.vlgmr.msra.gmra.mxu1 %vm529_vm0, %v521_v7  ;;  %1210 = vmatmul.msk.f32.vlgmr.msra.gmra.mxu3 %vm529_vm0, %v523_v8  ;;  %v761_v2 = vld [vmem:[%s757_s13 + $0x18] sm:$0xff]  ;;  %s910_s21 = scalar_lea.hbm (%p514_p4), %s2124_s7, %s2032_s27 }
  0x84   : >> { %780 = vmatpush.msrb.mxu0 %v758_v62  ;;  %826 = vmatpush.msrb.mxu2 %v760_v63  ;;  %s913_s13 = sshll.u32 (%p514_p4), %s910_s21, 4  ;;  %s914_s13 = int_to_ptr.hbm [resolvable:$true] %s913_s13 }
  0x85   : >> { %803 = vmatpush.msrb.mxu1 %v759_v1  ;;  %849 = vmatpush.msrb.mxu3 %v761_v2 }
  0xff   : >> { %v553_v12 = vpop.f32.mrf.mxu0 }
 0x100   : >> { %v634_v15 = vmul.f32 0.35355338, %v553_v12  ;;  %v579_v16 = vpop.f32.mrf.mxu1 }
 0x101   : >> { %v635_v18 = vmul.f32 0.35355338, %v579_v16 }
 0x102   : >> { %v643_v19 = vadd.f32 %v639_v13, %v634_v15 }
 0x103   : >> { %v644_v20 = vadd.f32 %v640_v17, %v635_v18 }
 0x104   : >> { %v647_v22 = vadd.f32 %v643_v19, %v1922_v0 }
 0x105   : >> { %v605_v23 = vpop.f32.mrf.mxu2  ;;  %v648_v25 = vadd.f32 %v644_v20, %v1922_v0 }
 0x106   : >> { %v636_v26 = vmul.f32 0.35355338, %v605_v23  ;;  %v657_v27 = vsel %vm1958_vm2, -inf, %v647_v22  ;;  %v631_v28 = vpop.f32.mrf.mxu3 }
 0x107   : >> { %v661_v30 = vsel %vm529_vm0, %v657_v27, -inf  ;;  %865 = vst.msk [vmem:[%s864_s11] sm:$0xff] %vm529_vm0, %v657_v27  ;;  %v637_v31 = vmul.f32 0.35355338, %v631_v28  ;;  %v658_v32 = vsel %vm1958_vm2, -inf, %v648_v25 }
 0x108   : >> { %v645_v33 = vadd.f32 %v641_v24, %v636_v26  ;;  %662 = vmax.xlane.f32.xlu1 %v661_v30  ;;  %866 = vst.msk [vmem:[%s864_s11 + $0x8] sm:$0xff] %vm529_vm0, %v658_v32  ;;  %v664_v39 = vsel %vm529_vm0, %v658_v32, -inf }
 0x109   : >> { %v646_v34 = vadd.f32 %v642_v29, %v637_v31 }
 0x10a   : >> { %v649_v35 = vadd.f32 %v645_v33, %v1922_v0 }
 0x10b   : >> { %v650_v36 = vadd.f32 %v646_v34, %v1922_v0 }
 0x10c   : >> { %v659_v37 = vsel %vm1958_vm2, -inf, %v649_v35 }
 0x10d   : >> { %v667_v38 = vsel %vm529_vm0, %v659_v37, -inf  ;;  %867 = vst.msk [vmem:[%s864_s11 + $0x10] sm:$0xff] %vm529_vm0, %v659_v37  ;;  %v660_v40 = vsel %vm1958_vm2, -inf, %v650_v36 }
 0x10e   : >> { %668 = vmax.xlane.f32.xlu0 %v667_v38  ;;  %868 = vst.msk [vmem:[%s864_s11 + $0x18] sm:$0xff] %vm529_vm0, %v660_v40  ;;  %v670_v41 = vsel %vm529_vm0, %v660_v40, -inf  ;;  %s911_s11 = sshll.u32 (%p514_p4), %s491_s23, 4  ;;  %s912_s11 = int_to_ptr.vmem [resolvable:$true] %s911_s11 }
 0x110   : >> { %665 = vmax.xlane.f32.xlu1 %v664_v39 }
 0x116   : >> { %671 = vmax.xlane.f32.xlu0 %v670_v41 }
 0x17b   : >> { %v663_v42 = vpop.xlane.xlu1 %662 }
 0x17c   : >> { %v673_v43 = vsub.f32 %v657_v27, %v663_v42 }
 0x17e   : >> { %v677_v44 = vmul.f32 1.442695, %v673_v43 }
 0x180   : >> { %1338 = vpow2.f32 %v677_v44 }
 0x181   : >> { %v669_v45 = vpop.xlane.xlu0 %668 }
 0x182   : >> { %v675_v46 = vsub.f32 %v659_v37, %v669_v45 }
 0x183   : >> { %v666_v47 = vpop.xlane.xlu1 %665 }
 0x184   : >> { %v681_v48 = vmul.f32 1.442695, %v675_v46  ;;  %v674_v49 = vsub.f32 %v658_v32, %v666_v47 }
 0x186   : >> { %v1339_v50 = vpop.eup %1338  ;;  %1340 = vpow2.f32 %v681_v48  ;;  %v679_v51 = vmul.f32 1.442695, %v674_v49 }
 0x187   : >> { %v685_v52 = vsel %vm529_vm0, %v1339_v50, 0.0 }
 0x188   : >> { %1342 = vpow2.f32 %v679_v51  ;;  %686 = vadd.xlane.f32.xlu0 %v685_v52 }
 0x189   : >> { %v672_v53 = vpop.xlane.xlu0 %671 }
 0x18a   : >> { %v676_v54 = vsub.f32 %v660_v40, %v672_v53 }
 0x18c   : >> { %v1986_v55 = vpop.eup %1340  ;;  %v683_v56 = vmul.f32 1.442695, %v676_v54 }
 0x18d   : >> { %v691_v57 = vsel %vm529_vm0, %v1986_v55, 0.0 }
 0x18e   : >> { %v1990_v58 = vpop.eup %1342  ;;  %1344 = vpow2.f32 %v683_v56  ;;  %692 = vadd.xlane.f32.xlu2 %v691_v57 }
 0x18f   : >> { %v688_v59 = vsel %vm529_vm0, %v1990_v58, 0.0 }
 0x190   : >> { %689 = vadd.xlane.f32.xlu1 %v688_v59 }
 0x194   : >> { %v1994_v60 = vpop.eup %1344 }
 0x195   : >> { %v694_v61 = vsel %vm529_vm0, %v1994_v60, 0.0 }
 0x196   : >> { %695 = vadd.xlane.f32.xlu2 %v694_v61 }
 0x1fb   : >> { %v687_v3 = vpop.xlane.xlu0 %686 }
 0x1fc   : >> { %1346 = vrcp.f32 %v687_v3  ;;  %v708_v9 = vand.u32 2147483648, %v687_v3  ;;  %v706_v11 = vand.u32 2147483647, %v687_v3  ;;  %vm702_vm4 = vweird.f32 %v687_v3 }
 0x1fe   : >> { %v709_v17 = vor.u32 1.1754944e-38, %v708_v9  ;;  %vm707_vm6 = vcmp.eq.f32.partialorder %v706_v11, 8.507059e+37 }
 0x201   : >> { %v693_v4 = vpop.xlane.xlu2 %692 }
 0x202   : >> { %v1347_v5 = vpop.eup %1346  ;;  %1348 = vrcp.f32 %v693_v4  ;;  %v736_v21 = vand.u32 2147483647, %v693_v4  ;;  %v738_v22 = vand.u32 2147483648, %v693_v4  ;;  %vm732_vm8 = vweird.f32 %v693_v4 }
 0x203   : >> { %v698_v6 = vmul.f32 %v1347_v5, %v687_v3  ;;  %v690_v7 = vpop.xlane.xlu1 %689  ;;  %vm703_vm3 = vweird.f32 %v1347_v5 }
 0x204   : >> { %1350 = vrcp.f32 %v690_v7  ;;  %vm704_vm5 = vmor %vm702_vm4, %vm703_vm3  ;;  %v723_v27 = vand.u32 2147483648, %v690_v7  ;;  %v721_v30 = vand.u32 2147483647, %v690_v7  ;;  %vm737_vm11 = vcmp.eq.f32.partialorder %v736_v21, 8.507059e+37 }
 0x205   : >> { %v699_v8 = vsub.f32 1.0, %v698_v6  ;;  %v739_v32 = vor.u32 1.1754944e-38, %v738_v22  ;;  %vm717_vm12 = vweird.f32 %v690_v7 }
 0x206   : >> { %v724_v36 = vor.u32 1.1754944e-38, %v723_v27  ;;  %vm722_vm14 = vcmp.eq.f32.partialorder %v721_v30, 8.507059e+37 }
 0x207   : >> { %v700_v10 = vmul.f32 %v1347_v5, %v699_v8 }
 0x208   : >> { %v1349_v12 = vpop.eup %1348 }
 0x209   : >> { %v701_v13 = vadd.f32 %v1347_v5, %v700_v10  ;;  %v728_v14 = vmul.f32 %v1349_v12, %v693_v4  ;;  %v696_v15 = vpop.xlane.xlu2 %695  ;;  %vm733_vm7 = vweird.f32 %v1349_v12 }
 0x20a   : >> { %v1351_v16 = vpop.eup %1350  ;;  %1352 = vrcp.f32 %v696_v15  ;;  %vm734_vm10 = vmor %vm732_vm8, %vm733_vm7  ;;  %v753_v41 = vand.u32 2147483648, %v696_v15  ;;  %v751_v44 = vand.u32 2147483647, %v696_v15  ;;  %vm747_vm1 = vweird.f32 %v696_v15 }
 0x20b   : >> { %v705_v18 = vsel %vm704_vm5, %v1347_v5, %v701_v13  ;;  %v729_v19 = vsub.f32 1.0, %v728_v14  ;;  %v713_v20 = vmul.f32 %v1351_v16, %v690_v7  ;;  %vm718_vm9 = vweird.f32 %v1351_v16 }
 0x20c   : >> { %v710_v23 = vsel %vm707_vm6, %v709_v17, %v705_v18  ;;  %vm719_vm13 = vmor %vm717_vm12, %vm718_vm9  ;;  %v754_v47 = vor.u32 1.1754944e-38, %v753_v41  ;;  %vm752_vm3 = vcmp.eq.f32.partialorder %v751_v44, 8.507059e+37 }
 0x20d   : >> { %v730_v24 = vmul.f32 %v1349_v12, %v729_v19  ;;  %v714_v25 = vsub.f32 1.0, %v713_v20  ;;  %v711_v26 = vmul.f32 %v1339_v50, %v710_v23 }
 0x20f   : >> { %v731_v28 = vadd.f32 %v1349_v12, %v730_v24  ;;  %v715_v29 = vmul.f32 %v1351_v16, %v714_v25  ;;  %1211 = vmatmul.msk.f32.vlgmr.msrb.gmra.mxu0 %vm529_vm0, %v711_v26  ;;  %860 = vst.msk [vmem:[%s2004_s26] sm:$0xff] %vm529_vm0, %v711_v26 }
 0x210   : >> { %v1353_v31 = vpop.eup %1352 }
 0x211   : >> { %v716_v33 = vadd.f32 %v1351_v16, %v715_v29  ;;  %v743_v34 = vmul.f32 %v1353_v31, %v696_v15  ;;  %v735_v35 = vsel %vm734_vm10, %v1349_v12, %v731_v28  ;;  %vm748_vm15 = vweird.f32 %v1353_v31 }
 0x212   : >> { %v740_v37 = vsel %vm737_vm11, %v739_v32, %v735_v35  ;;  %vm749_vm2 = vmor %vm747_vm1, %vm748_vm15 }
 0x213   : >> { %v720_v38 = vsel %vm719_vm13, %v1351_v16, %v716_v33  ;;  %v744_v39 = vsub.f32 1.0, %v743_v34  ;;  %v741_v40 = vmul.f32 %v1986_v55, %v740_v37 }
 0x214   : >> { %v725_v42 = vsel %vm722_vm14, %v724_v36, %v720_v38 }
 0x215   : >> { %v745_v43 = vmul.f32 %v1353_v31, %v744_v39  ;;  %1213 = vmatmul.msk.f32.vlgmr.msrb.gmra.mxu2 %vm529_vm0, %v741_v40  ;;  %862 = vst.msk [vmem:[%s2004_s26 + $0x10] sm:$0xff] %vm529_vm0, %v741_v40  ;;  %v726_v45 = vmul.f32 %v1990_v58, %v725_v42 }
 0x217   : >> { %v746_v46 = vadd.f32 %v1353_v31, %v745_v43  ;;  %1212 = vmatmul.msk.f32.vlgmr.msrb.gmra.mxu1 %vm529_vm0, %v726_v45  ;;  %861 = vst.msk [vmem:[%s2004_s26 + $0x8] sm:$0xff] %vm529_vm0, %v726_v45 }
 0x219   : >> { %v750_v48 = vsel %vm749_vm2, %v1353_v31, %v746_v46 }
 0x21a   : >> { %v755_v49 = vsel %vm752_vm3, %v754_v47, %v750_v48 }
 0x21b   : >> { %v756_v50 = vmul.f32 %v1994_v60, %v755_v49 }
 0x21d   : >> { %1214 = vmatmul.msk.f32.vlgmr.msrb.gmra.mxu3 %vm529_vm0, %v756_v50  ;;  %863 = vst.msk [vmem:[%s2004_s26 + $0x18] sm:$0xff] %vm529_vm0, %v756_v50  ;;  %s875_s26 = scalar_lea.sflag (%p514_p4), [#allocation13], %s1896_s18 }
 0x28c   : >> { %v782_v51 = vpop.f32.mrf.mxu0 }
 0x28d   : >> { %855 = vst.msk [vmem:[%s854_s24] sm:$0xff] %vm529_vm0, %v782_v51 }
 0x294   : >> { %v805_v52 = vpop.f32.mrf.mxu1 }
 0x295   : >> { %856 = vst.msk [vmem:[%s854_s24 + $0x8] sm:$0xff] %vm529_vm0, %v805_v52 }
 0x298   : >> { %v828_v53 = vpop.f32.mrf.mxu2 }
 0x299   : >> { %857 = vst.msk [vmem:[%s854_s24 + $0x10] sm:$0xff] %vm529_vm0, %v828_v53 }
 0x29d   : > { %516 = sbr.rel (!%p514_p4) target bundleno = 124 (0x7c), region = 180 }
 0x2a0   : >> { %v851_v54 = vpop.f32.mrf.mxu3 }
 0x2a1   : >> { %858 = vst.msk [vmem:[%s854_s24 + $0x18] sm:$0xff] %vm529_vm0, %v851_v54  ;;  %s1518_s24 = sshra.s32 (%p514_p4), %s914_s13, 4  ;;  %s1519_s24 = int_to_ptr.hbm [resolvable:$true] %s1518_s24 }
 0x2a2   : > { %s1520_s20 = scalar_lea.hbm %s1519_s24, 64  ;;  %p1525_p1 = scmp.lt.s32.totalorder %s1519_s24, %s2124_s7 }
 0x2a3   : > { %p1521_p6 = scmp.ne.s32.totalorder %s1519_s24, %s1520_s20  ;;  %p1526_p5 = scmp.lt.s32.totalorder %s1524_s12, %s1520_s20 }
 0x2a5   : > { %p1522_p7 = pnand %p1521_p6, %p1757_p11  ;;  %p1527_p9 = por %p1526_p5, %p1525_p1 }
 0x2a7   : > { %p1523_p8 = pneg %p1522_p7 }
 0x2a9   : > { %p1528_p10 = pnand %p1527_p9, %p1523_p8 }
 0x2ab   : > { %1531 = shalt.err (!%p1528_p10)
}
 0x2ac   : > { %s1656_s8 = smov 128   ;;  %s1657_s16 = smov 8  }
 0x2ad   : > { %1256 = dma.vmem_to_hbm [thread:$0]  (%p1757_p11), %s912_s11, 1024, %s914_s13, %s875_s26, %s1656_s8, %s1656_s8, %s1657_s16  }
 0x2ae   : > { %s892_s14 = scalar_lea.hbm %s2123_s6, %s2032_s27  ;;  %s893_s21 = sshll.u32 %s484_s1, 4  ;;  %s894_s21 = int_to_ptr.vmem [resolvable:$true] %s893_s21 }
 0x2af   : > { %s895_s24 = sshll.u32 %s892_s14, 4  ;;  %s2159_s10 = sld [smem:[#allocation28_spill]]  ;;  %s896_s24 = int_to_ptr.hbm [resolvable:$true] %s895_s24 }
 0x2b0   : > { %s870_s22 = scalar_lea.sflag [#allocation4], %s1884_s4  ;;  %s1546_s25 = sshra.s32 %s896_s24, 4  ;;  %s1547_s25 = int_to_ptr.hbm [resolvable:$true] %s1546_s25 }
 0x2b1   : > { %s1548_s15 = scalar_lea.hbm %s1547_s25, 64  ;;  %s1552_s23 = scalar_lea.hbm %s2123_s6, 128 }
 0x2b2   : > { %p1549_p0 = scmp.ne.s32.totalorder %s1547_s25, %s1548_s15  ;;  %p1553_p13 = scmp.lt.s32.totalorder %s1547_s25, %s2123_s6 }
 0x2b3   : > { %p1554_p4 = scmp.lt.s32.totalorder %s1552_s23, %s1548_s15 }
 0x2b4   : > { %p1550_p2 = pnand %p1549_p0, %p1757_p11 }
 0x2b5   : > { %s928_s12 = scalar_lea.hbm %s2159_s10, %s2032_s27  ;;  %p1555_p6 = por %p1554_p4, %p1553_p13 }
 0x2b6   : > { %p1551_p3 = pneg %p1550_p2 }
 0x2b8   : > { %p1556_p7 = pnand %p1555_p6, %p1551_p3 }
 0x2ba   : > { %1559 = shalt.err (!%p1556_p7)
}
 0x2bb   : > { %1255 = dma.vmem_to_hbm [thread:$0]  (%p1757_p11), %s894_s21, 1024, %s896_s24, %s870_s22, %s1656_s8, %s1656_s8, %s1657_s16  }
 0x2bc   : > { %s2160_s4 = scalar_lea.vmem [#allocation14], %s1887_s0  ;;  %s931_s14 = sshll.u32 %s928_s12, 4  ;;  %s932_s14 = int_to_ptr.hbm [resolvable:$true] %s931_s14 }
 0x2bd   : > { %s929_s27 = sshll.u32 %s2160_s4, 4  ;;  %s1574_s20 = sshra.s32 %s932_s14, 4  ;;  %s930_s27 = int_to_ptr.vmem [resolvable:$true] %s929_s27  ;;  %s1575_s20 = int_to_ptr.hbm [resolvable:$true] %s1574_s20 }
 0x2be   : > { %s1576_s9 = scalar_lea.hbm %s1575_s20, 64  ;;  %s1580_s11 = scalar_lea.hbm %s2159_s10, 128 }
 0x2bf   : > { %p1577_p8 = scmp.ne.s32.totalorder %s1575_s20, %s1576_s9  ;;  %p1581_p9 = scmp.lt.s32.totalorder %s1575_s20, %s2159_s10 }
 0x2c0   : > { %p1582_p10 = scmp.lt.s32.totalorder %s1580_s11, %s1576_s9 }
 0x2c1   : > { %p1578_p1 = pnand %p1577_p8, %p1757_p11 }
 0x2c2   : > { %p1583_p0 = por %p1582_p10, %p1581_p9 }
 0x2c3   : > { %p1579_p5 = pneg %p1578_p1 }
 0x2c5   : > { %p1584_p2 = pnand %p1583_p0, %p1579_p5 }
 0x2c7   : > { %1587 = shalt.err (!%p1584_p2)
}
 0x2c8   : > { %1257 = dma.vmem_to_hbm [thread:$0]  (%p1757_p11), %s930_s27, 1024, %s932_s14, %s875_s26, %s1656_s8, %s1656_s8, %s1657_s16  }
 0x2c9 PF: > { %s2161_s0 = sld [smem:[#allocation21_spill]]  ;;  %p2163_p3 = scmp.ge.s32.totalorder %s1646_s30, 2 }
 0x2cb   : > { %p1279_p13 = pnand %p2163_p3, %p1761_p12 }
 0x2cd   : > { %p1280_p4 = pneg %p1279_p13 }
 0x2cf   : > { %s946_s24 = sand.u32 1, %s2161_s0  }
 0x2d0   : > { %s947_s12 = scalar_lea.sflag [#allocation4], %s946_s24 }
 0x2d1   : > { %1625 = dma.done.wait (%p1280_p4), %s947_s12, 1024  }
 0x2d2   : > { %1627 = vsyncadd (%p1280_p4), %s947_s12, 4294966272  ;;  %s2164_s17 = sadd.s32 4294967294, %s1646_s30  }
 0x2d3   : > { %s956_s22 = sand.u32 1, %s2164_s17  }
 0x2d4   : > { %s957_s1 = scalar_lea.sflag [#allocation13], %s956_s22 }
 0x2d5   : > { %1629 = dma.done.wait (%p1280_p4), %s957_s1, 2048  }
 0x2d6   : > { %1631 = vsyncadd (%p1280_p4), %s957_s1, 4294965248  ;;  %s2165_s30 = sld [smem:[#allocation22_spill]]  ;;  %s2167_s27 = smov %s1638_s28 }
 0x2d7   : > { %s2166_s18 = sld [smem:[#allocation23_spill]]  ;;  %s2168_s28 = smov %s1642_s29 }
 0x2dc   : > { %p31_p11 = scmp.ge.s32.totalorder %s2165_s30, 4  }
 0x2dd   : > { %s2169_s29 = smov %s2166_s18 }
 0x2de   :  { %33 = sbr.rel (!%p31_p11) target bundleno = 16 (0x10), region = 191 }
 0x2e3   :  { %973 = vsyncpa [#allocation3], 1 }
 0x2e4   :  { %975 = vsyncpa [#allocation3 + $0x1], 1 }
 0x2e5   :  { %976 = vsyncpa [#allocation6], 1 }
 0x2e6   :  { %978 = vsyncpa [#allocation6 + $0x1], 1 }
 0x2e7   :  { %979 = vsyncpa [#allocation9], 1 }
 0x2e8   :  { %981 = vsyncpa [#allocation9 + $0x1], 1 }
 0x2e9   :  { %982 = vsyncpa [#allocation4], 1 }
 0x2ea   :  { %984 = vsyncpa [#allocation4 + $0x1], 1 }
 0x2eb   :  { %985 = vsyncpa [#allocation13], 1 }
 0x2ec   :  { %987 = vsyncpa [#allocation13 + $0x1], 1 }

</bundles_post_ra>
